<compile_context>
chip_gen: v7x
topology: tpu7x:2x2x1
jax: 0.10.0
libtpu: 0.0.40
codegen_flags: <defaults>
</compile_context>

<pallas_src>
import numpy as np
import jax
import jax.numpy as jnp
from jax.experimental import pallas as pl
from jax.experimental.pallas import tpu as pltpu

B = 2          # batch
C_IN = 4       # num_channels
C_OUT = 64     # conv out channels
K = 5          # conv kernel size
L = 128        # sequence length (=> pooled length 64 => fc in = 64*64)
PAD = 2
KC = K * C_IN  # 20  im2col contraction depth
BL = B * L     # 256 fused lane width (both batches)


def cnn_kernel(rhs_ref, wc_ref, bc_ref, wf_ref, bf_ref, out_ref):
    # rhs_ref: (KC, BL)     im2col input, batches lane-concatenated   (VMEM)
    # wc_ref : (C_OUT, KC)  conv weight, row index = k*C_IN + c       (VMEM)
    # bc_ref : (C_OUT, 1)   conv bias                                 (VMEM)
    # wf_ref : (C_OUT, BL)  fc weight, zeros at odd lanes, tiled x B  (VMEM)
    # bf_ref : (1,)         fc bias                                   (SMEM)
    # out_ref: (B, 1)       sigmoid output                            (VMEM)

    # Conv1d for both batches and all taps: one MXU matmul, K*C_IN=20-deep.
    acc = jnp.dot(wc_ref[...], rhs_ref[...],
                  preferred_element_type=jnp.float32)        # (C_OUT, BL)
    y = jnp.maximum(acc + bc_ref[...], 0.0)                  # bias + ReLU

    # MaxPool1d(kernel=2, stride=2): pair each even lane with its right
    # neighbour.  shift = BL-1 == -1 (mod BL), i.e. y_shift[i] = y[i+1]
    # (positive amount avoids any negative-shift lowering edge case).
    # Odd-lane results — including the wrap lanes at 127 and 255, which would
    # mix batches — are zeroed by the zero-expanded fc weight below.
    y_shift = pltpu.roll(y, shift=BL - 1, axis=1)
    m = jnp.maximum(y, y_shift)                              # (C_OUT, BL)

    # Fused flatten + Linear(64*64, 1): masked weighted reduce.
    prod = wf_ref[...] * m                                   # (C_OUT, BL)
    col = jnp.sum(prod, axis=0, keepdims=True)               # (1, BL) sublane reduce
    s0 = jnp.sum(col[:, :L], axis=1, keepdims=True)          # (1, 1) batch 0
    s1 = jnp.sum(col[:, L:], axis=1, keepdims=True)          # (1, 1) batch 1
    logits = jnp.concatenate([s0, s1], axis=0) + bf_ref[0]   # (B, 1)
    # TODO(synk): Dropout(0.5) is identity in eval mode; train-mode dropout not implemented.
    out_ref[...] = 1.0 / (1.0 + jnp.exp(-logits))            # Sigmoid


def simple_cnn_forward(x, w_conv, b_conv, w_fc, b_fc):
    """x: (B, C_IN, L) float32 — NCW like the PyTorch module."""
    # ---- glue: pure layout prep (no compute) ----
    xp = jnp.pad(x, ((0, 0), (0, 0), (PAD, PAD)))                     # (B, C_IN, L+4)
    # im2col: rhs[k*C_IN + c, b*L + t] = xp[b, c, t + k]
    cols = jnp.stack([xp[:, :, k:k + L] for k in range(K)], axis=1)   # (B, K, C_IN, L)
    rhs = jnp.transpose(cols, (1, 2, 0, 3)).reshape(KC, BL)           # (20, 256)
    # conv weight (C_OUT, C_IN, K) -> (C_OUT, K*C_IN), matching rhs row order.
    w_mm = jnp.transpose(w_conv, (0, 2, 1)).reshape(C_OUT, KC)        # (64, 20)
    bc2 = b_conv.reshape(C_OUT, 1)
    # PyTorch flatten order of (B, C, T) is feature index = c*T + t.
    wf2 = w_fc.reshape(C_OUT, L // 2)                                 # (64, 64)
    wf_exp = jnp.zeros((C_OUT, L), jnp.float32).at[:, 0::2].set(wf2)  # zeros on odd lanes
    wf_b = jnp.tile(wf_exp, (1, B))                                   # (64, 256)
    bf = b_fc.reshape(1).astype(jnp.float32)

    return pl.pallas_call(
        cnn_kernel,
        out_shape=jax.ShapeDtypeStruct((B, 1), jnp.float32),
        in_specs=[
            pl.BlockSpec(memory_space=pltpu.MemorySpace.VMEM),  # rhs (im2col)
            pl.BlockSpec(memory_space=pltpu.MemorySpace.VMEM),  # conv w
            pl.BlockSpec(memory_space=pltpu.MemorySpace.VMEM),  # conv b
            pl.BlockSpec(memory_space=pltpu.MemorySpace.VMEM),  # fc w (masked, tiled)
            pl.BlockSpec(memory_space=pltpu.MemorySpace.SMEM),  # fc b
        ],
        out_specs=pl.BlockSpec(memory_space=pltpu.MemorySpace.VMEM),
    )(rhs, w_mm, bc2, wf_b, bf)


def reference_forward(x, w_conv, b_conv, w_fc, b_fc):
    """Pure-JAX replica of the PyTorch module (eval mode)."""
    y = jax.lax.conv_general_dilated(
        x, w_conv, window_strides=(1,), padding=[(PAD, PAD)],
        dimension_numbers=("NCH", "OIH", "NCH"))
    y = jnp.maximum(y + b_conv[None, :, None], 0.0)
    pooled = jnp.max(y.reshape(B, C_OUT, L // 2, 2), axis=-1)
    flat = pooled.reshape(B, -1)
    logits = flat @ w_fc.T + b_fc
    return jax.nn.sigmoid(logits)


if __name__ == "__main__":
    key = jax.random.PRNGKey(0)
    k1, k2, k3, k4, k5 = jax.random.split(key, 5)

    # Deterministic parameter init (PyTorch-style uniform bounds).
    fan_conv = C_IN * K
    bc_bound = 1.0 / np.sqrt(fan_conv)
    w_conv = jax.random.uniform(k1, (C_OUT, C_IN, K), jnp.float32, -bc_bound, bc_bound)
    b_conv = jax.random.uniform(k2, (C_OUT,), jnp.float32, -bc_bound, bc_bound)

    fan_fc = C_OUT * (L // 2)                                   # 64 * 64
    fc_bound = 1.0 / np.sqrt(fan_fc)
    w_fc = jax.random.uniform(k3, (1, fan_fc), jnp.float32, -fc_bound, fc_bound)
    b_fc = jax.random.uniform(k4, (1,), jnp.float32, -fc_bound, fc_bound)

    x = jax.random.normal(k5, (B, C_IN, L), jnp.float32)

    out = jax.block_until_ready(simple_cnn_forward(x, w_conv, b_conv, w_fc, b_fc))
    ref = jax.block_until_ready(reference_forward(x, w_conv, b_conv, w_fc, b_fc))

    assert out.shape == (B, 1), out.shape
    np.testing.assert_allclose(np.asarray(out), np.asarray(ref), rtol=1e-4, atol=1e-4)
    print("KERNEL_OK")
</pallas_src>

<mosaic_0001>
module attributes {stable_mosaic.version = 11 : i64} {
  func.func @cnn_kernel(%arg0: memref<20x256xf32, #tpu.memory_space<vmem>>, %arg1: memref<64x20xf32, #tpu.memory_space<vmem>>, %arg2: memref<64x1xf32, #tpu.memory_space<vmem>>, %arg3: memref<64x256xf32, #tpu.memory_space<vmem>>, %arg4: memref<1xf32, #tpu.memory_space<smem>>, %arg5: memref<2x1xf32, #tpu.memory_space<vmem>>) attributes {dimension_semantics = [], scalar_prefetch = 0 : i64, scratch_operands = 0 : i64, tpu.core_type = #tpu.core_type<tc>} {
    %c0 = arith.constant 0 : index
    %c0_0 = arith.constant 0 : index
    %0 = vector.load %arg1[%c0, %c0_0] : memref<64x20xf32, #tpu.memory_space<vmem>>, vector<64x20xf32>
    %c0_1 = arith.constant 0 : index
    %c0_2 = arith.constant 0 : index
    %1 = vector.load %arg0[%c0_1, %c0_2] : memref<20x256xf32, #tpu.memory_space<vmem>>, vector<20x256xf32>
    %cst = arith.constant dense<0.000000e+00> : vector<64x256xf32>
    %2 = tpu.matmul %0, %1, %cst {dimension_numbers = #tpu.dot_dimension_numbers<[1], [0], [0], [1], [0, 0, 1, 1], [], []>} : vector<64x20xf32>, vector<20x256xf32>, vector<64x256xf32> -> vector<64x256xf32>
    %c0_3 = arith.constant 0 : index
    %c0_4 = arith.constant 0 : index
    %3 = vector.load %arg2[%c0_3, %c0_4] : memref<64x1xf32, #tpu.memory_space<vmem>>, vector<64x1xf32>
    %4 = vector.broadcast %3 : vector<64x1xf32> to vector<64x256xf32>
    %5 = arith.addf %2, %4 : vector<64x256xf32>
    %cst_5 = arith.constant 0.000000e+00 : f32
    %6 = vector.broadcast %cst_5 : f32 to vector<64x256xf32>
    %7 = arith.maximumf %5, %6 : vector<64x256xf32>
    %c255_i32 = arith.constant 255 : i32
    %8 = tpu.dynamic_rotate %7 by %c255_i32 dim 1 : vector<64x256xf32>, i32 -> vector<64x256xf32>
    %9 = arith.maximumf %7, %8 : vector<64x256xf32>
    %c0_6 = arith.constant 0 : index
    %c0_7 = arith.constant 0 : index
    %10 = vector.load %arg3[%c0_6, %c0_7] : memref<64x256xf32, #tpu.memory_space<vmem>>, vector<64x256xf32>
    %11 = arith.mulf %10, %9 : vector<64x256xf32>
    %cst_8 = arith.constant dense<0.000000e+00> : vector<256xf32>
    %12 = vector.multi_reduction <add>, %11, %cst_8 [0] : vector<64x256xf32> to vector<256xf32>
    %13 = vector.shape_cast %12 : vector<256xf32> to vector<1x256xf32>
    %14 = vector.extract_strided_slice %13 {offsets = [0, 0], sizes = [1, 128], strides = [1, 1]} : vector<1x256xf32> to vector<1x128xf32>
    %cst_9 = arith.constant dense<0.000000e+00> : vector<1xf32>
    %15 = vector.multi_reduction <add>, %14, %cst_9 [1] : vector<1x128xf32> to vector<1xf32>
    %16 = vector.shape_cast %15 : vector<1xf32> to vector<1x1xf32>
    %17 = vector.extract_strided_slice %13 {offsets = [0, 128], sizes = [1, 128], strides = [1, 1]} : vector<1x256xf32> to vector<1x128xf32>
    %cst_10 = arith.constant dense<0.000000e+00> : vector<1xf32>
    %18 = vector.multi_reduction <add>, %17, %cst_10 [1] : vector<1x128xf32> to vector<1xf32>
    %19 = vector.shape_cast %18 : vector<1xf32> to vector<1x1xf32>
    %20 = tpu.concatenate %16, %19 in 0 : vector<1x1xf32>, vector<1x1xf32> -> vector<2x1xf32>
    %c0_11 = arith.constant 0 : index
    %21 = memref.load %arg4[%c0_11] : memref<1xf32, #tpu.memory_space<smem>>
    %22 = vector.broadcast %21 : f32 to vector<2x1xf32>
    %23 = arith.addf %20, %22 : vector<2x1xf32>
    %cst_12 = arith.constant 0.000000e+00 : f32
    %24 = vector.broadcast %cst_12 : f32 to vector<2x1xf32>
    %25 = arith.subf %24, %23 : vector<2x1xf32>
    %26 = math.exp %25 : vector<2x1xf32>
    %cst_13 = arith.constant 1.000000e+00 : f32
    %27 = vector.broadcast %cst_13 : f32 to vector<2x1xf32>
    %28 = arith.addf %27, %26 : vector<2x1xf32>
    %cst_14 = arith.constant 1.000000e+00 : f32
    %29 = vector.broadcast %cst_14 : f32 to vector<2x1xf32>
    %30 = arith.divf %29, %28 : vector<2x1xf32>
    %c0_15 = arith.constant 0 : index
    %c0_16 = arith.constant 0 : index
    %31 = vector.load %arg5[%c0_15, %c0_16] : memref<2x1xf32, #tpu.memory_space<vmem>>, vector<2x1xf32>
    tpu.vector_store %arg5[%c0_15, %c0_16], %30 {strides = array<i32>} : memref<2x1xf32, #tpu.memory_space<vmem>>, vector<2x1xf32>,
    return
  }
}

</mosaic_0001>

<bundles_post_ra>
// kernel: tpu_custom_call.1
= control target key start
LH: loop header
LB: loop body
LE: loop exit
PB: predicated region body
PF: predicated region fallthrough
CT: control target
= control target key end

     0   :  { %11 = vsyncpa [#allocation4], 0  ;;  %s459_s18 = smov [#allocation3]   ;;  %s768_s0 = inlined_call_operand.hbm [shape: f32[20,256], index: 0, kind: input, shape index: {}]   ;;  %s769_s1 = inlined_call_operand.vmem [shape: f32[64,20], index: 1, kind: input, shape index: {}]   ;;  %s770_s2 = inlined_call_operand.vmem [shape: f32[64,1], index: 2, kind: input, shape index: {}]   ;;  %s771_s3 = inlined_call_operand.vmem [shape: f32[64,256], index: 3, kind: input, shape index: {}]   ;;  %s772_s4 = inlined_call_operand.<no memory space> [shape: f32[1], index: 4, kind: input, shape index: {}]   ;;  %s773_s5 = inlined_call_operand.vmem [shape: f32[2,1], index: 5, kind: output, shape index: {}]  }
   0x1   :  { %s17_s19 = sshll.u32 %s459_s18, 4  ;;  %s435_s22 = scalar_lea.hbm %s768_s0, 768  ;;  %s18_s19 = int_to_ptr.vmem [resolvable:$true] %s17_s19 }
   0x2   :  { %p436_p0 = scmp.ne.s32.totalorder %s768_s0, %s435_s22  ;;  %p439_p1 = scmp.lt.u32.totalorder %s435_s22, %s768_s0 }
   0x4   :  { %p441_p2 = pnand %p439_p1, %p436_p0 }
   0x6   :  { %444 = shalt.err (!%p441_p2)
}
   0x7   :  { %s445_s27 = scalar_lea.vmem %s18_s19, 768  ;;  %p450_p4 = scmp.lt.s32.totalorder %s18_s19, %s18_s19 }
   0x8   :  { %p446_p3 = scmp.ne.s32.totalorder %s18_s19, %s445_s27  ;;  %p451_p5 = scmp.lt.s32.totalorder %s445_s27, %s445_s27 }
   0xa   :  { %p452_p6 = por %p451_p5, %p450_p4 }
   0xc   :  { %p453_p7 = pnand %p452_p6, %p446_p3 }
   0xe   :  { %456 = shalt.err (!%p453_p7)
}
   0xf   :  { %s460_s28 = smov 256   ;;  %s461_s29 = smov 16  }
  0x10   :  { %23 = dma.hbm_to_vmem [thread:$0]  %s768_s0, 768, %s18_s19, [#allocation4], %s460_s28, %s460_s28, %s461_s29  }
  0x11   :  { %457 = dma.done.wait [#allocation4], 768  }
  0x12   :  { %458 = vsyncadd [#allocation4], 4294966528  ;;  %v462_v0 = vmov 0.0   ;;  %v463_v1 = vmov 0   ;;  %v44_v2 = vld [vmem:[#allocation3 + $0x8] sm:$0xff]  ;;  %v46_v3 = vld [vmem:[#allocation3 + $0x18] sm:$0xff] }
  0x13   :  { %193 = vmatprep.mubr.f32.mxu0 %v462_v0  ;;  %217 = vmatprep.mubr.f32.mxu1 %v462_v0  ;;  %v43_v4 = vld [vmem:[#allocation3] sm:$0xff]  ;;  %v415_v5 = vpack.c.bf16 %v46_v3, %v44_v2  ;;  %v45_v6 = vld [vmem:[#allocation3 + $0x10] sm:$0xff]  ;;  %v48_v8 = vld [vmem:[#allocation3 + $0x28] sm:$0xf]  ;;  %vm122_vm0 = vcmask 1043456   ;;  %vm97_vm1 = vcmask 162816  }
  0x14   :  { %429 = vset.pattern.permute.xlu0 %v463_v1  ;;  %430 = vset.pattern.permute.xlu1 %v463_v1  ;;  %v417_v7 = vpack.c.bf16 %v45_v6, %v43_v4  ;;  %v49_v9 = vld [vmem:[%s770_s2] sm:$0xff]  ;;  %v51_v11 = vld [vmem:[%s770_s2 + $0x10] sm:$0xff]  ;;  %v50_v14 = vld [vmem:[%s770_s2 + $0x8] sm:$0xff]  ;;  %vm387_vm3 = vcmask 1040384   ;;  %vm398_vm4 = vcmask 1024  }
  0x15   :  { %416 = vmatprep.subr.bf16.mxu0 %v415_v5  ;;  %419 = vmatprep.subr.bf16.mxu1 %v415_v5  ;;  %v47_v10 = vld [vmem:[#allocation3 + $0x20] sm:$0xf]  ;;  %v52_v15 = vld [vmem:[%s770_s2 + $0x18] sm:$0xff]  ;;  %v36_v16 = vld [vmem:[%s769_s1 + $0x8] sm:$0xff] }
  0x16   :  { %418 = vmatpush1.bf16.msra.mxu0 %v417_v7  ;;  %421 = vmatpush1.bf16.msra.mxu1 %v417_v7  ;;  %v35_v12 = vld [vmem:[%s769_s1] sm:$0xff]  ;;  %v40_v17 = vld [vmem:[%s769_s1 + $0x28] sm:$0xff]  ;;  %v37_v20 = vld [vmem:[%s769_s1 + $0x10] sm:$0xff] }
  0x17   :  { %405 = vmatprep.subr.msk.mxu0 %vm122_vm0, %v48_v8  ;;  %420 = vmatprep.subr.msk.mxu1 %vm122_vm0, %v48_v8  ;;  %v39_v13 = vld [vmem:[%s769_s1 + $0x20] sm:$0xff]  ;;  %v54_v19 = vld [vmem:[%s770_s2 + $0x28] sm:$0xff]  ;;  %v41_v21 = vld [vmem:[%s769_s1 + $0x30] sm:$0xff] }
  0x18   :  { %59 = vperm.xlu0 %429, %v49_v9   ;;  %69 = vperm.xlu1 %430, %v51_v11   ;;  %v53_v18 = vld [vmem:[%s770_s2 + $0x20] sm:$0xff]  ;;  %v55_v22 = vld [vmem:[%s770_s2 + $0x30] sm:$0xff]  ;;  %v56_v23 = vld [vmem:[%s770_s2 + $0x38] sm:$0xff] }
  0x19   :  { %v38_v24 = vld [vmem:[%s769_s1 + $0x18] sm:$0xff] }
  0x1a   :  { %406 = vmatpush1.msk.msra.mxu0 %vm122_vm0, %v47_v10  ;;  %422 = vmatpush1.msk.msra.mxu1 %vm122_vm0, %v47_v10  ;;  %v42_v25 = vld [vmem:[%s769_s1 + $0x38] sm:$0xff]  ;;  %s464_s1 = smov 127  }
  0x1b   :  { %407 = vmatmul.mubr.msk.f32.vlgmr.msra.gmra.mrb[0].mxu0 %vm97_vm1, %v35_v12  ;;  %411 = vmatmul.mubr.msk.f32.vlgmr.msra.gmra.mrb[0].mxu1 %vm97_vm1, %v39_v13 }
  0x1c   :  { %199 = vmatprep.mubr.f32.mxu0 %v462_v0  ;;  %223 = vmatprep.mubr.f32.mxu1 %v462_v0 }
  0x1d   :  { %64 = vperm.xlu0 %429, %v50_v14   ;;  %74 = vperm.xlu1 %430, %v52_v15  }
  0x1f   :  { %408 = vmatmul.mubr.msk.f32.gmra.mrb[2].mxu0 %vm97_vm1, %v36_v16  ;;  %412 = vmatmul.mubr.msk.f32.gmra.mrb[2].mxu1 %vm97_vm1, %v40_v17 }
  0x20   :  { %205 = vmatprep.mubr.f32.mxu0 %v462_v0  ;;  %229 = vmatprep.mubr.f32.mxu1 %v462_v0 }
  0x21   :  { %79 = vperm.xlu0 %429, %v53_v18   ;;  %84 = vperm.xlu1 %430, %v54_v19  }
  0x23   :  { %409 = vmatmul.mubr.msk.f32.gmra.mrb[4].mxu0 %vm97_vm1, %v37_v20  ;;  %413 = vmatmul.mubr.msk.f32.gmra.mrb[4].mxu1 %vm97_vm1, %v41_v21  ;;  %v290_v20 = vlaneseq }
  0x24   :  { %211 = vmatprep.mubr.f32.mxu0 %v462_v0  ;;  %235 = vmatprep.mubr.f32.mxu1 %v462_v0 }
  0x25   :  { %89 = vperm.xlu0 %429, %v55_v22   ;;  %94 = vperm.xlu1 %430, %v56_v23   ;;  %v655_v23 = vand.u32 127, %v290_v20 }
  0x27   :  { %410 = vmatmul.mubr.msk.f32.gmra.mrb[6].mxu0 %vm97_vm1, %v38_v24  ;;  %414 = vmatmul.mubr.msk.f32.gmra.mrb[6].mxu1 %vm97_vm1, %v42_v25  ;;  %vm292_vm2 = vcmp.lt.s32.totalorder %v655_v23, 127 }
  0x97   :  { %v60_v26 = vpop.permute.xlu0 %59  ;;  %v70_v28 = vpop.permute.xlu1 %69 }
  0x9c   :  { %v65_v27 = vpop.permute.xlu0 %64  ;;  %v75_v36 = vpop.permute.xlu1 %74 }
  0xa0   :  { %v80_v29 = vpop.permute.xlu0 %79  ;;  %v85_v53 = vpop.permute.xlu1 %84 }
  0xa4   :  { %v90_v6 = vpop.permute.xlu0 %89  ;;  %v95_v11 = vpop.permute.xlu1 %94 }
  0xee   :  { %v195_v30 = vpop.f32.mrb[0].mxu0  ;;  %v219_v31 = vpop.f32.mrb[0].mxu1 }
  0xef   :  { %v567_v32 = vadd.f32 %v195_v30, %v60_v26  ;;  %v197_v33 = vpop.f32.mrb[1].mxu0  ;;  %v221_v34 = vpop.f32.mrb[1].mxu1  ;;  %v572_v38 = vadd.f32 %v219_v31, %v80_v29 }
  0xf0   :  { %v569_v35 = vadd.f32 %v221_v34, %v80_v29  ;;  %v584_v46 = vadd.f32 %v197_v33, %v60_v26 }
  0xf1   :  { %v242_v37 = vmax.f32 %v567_v32, 0.0  ;;  %v250_v45 = vmax.f32 %v572_v38, 0.0  ;;  %v328_v32 = vld [vmem:[%s771_s3 + $0x18] sm:$0xff]  ;;  %v333_v38 = vld [vmem:[%s771_s3 + $0x40] sm:$0xff] }
  0xf2   :  { %v251_v39 = vmax.f32 %v569_v35, 0.0  ;;  %v201_v40 = vpop.f32.mrb[2].mxu0  ;;  %v225_v41 = vpop.f32.mrb[2].mxu1  ;;  %v243_v54 = vmax.f32 %v584_v46, 0.0  ;;  %v334_v35 = vld [vmem:[%s771_s3 + $0x48] sm:$0xff] }
  0xf3   :  { %v575_v42 = vadd.f32 %v201_v40, %v65_v27  ;;  %v203_v43 = vpop.f32.mrb[3].mxu0  ;;  %v227_v44 = vpop.f32.mrb[3].mxu1  ;;  %258 = vrot.lane.b32.xlu0 %v242_v37, %s464_s1  ;;  %v596_v55 = vadd.f32 %v225_v41, %v85_v53  ;;  %v326_v40 = vld [vmem:[%s771_s3 + $0x8] sm:$0xff] }
  0xf4   :  { %282 = vrot.lane.b32.xlu1 %v251_v39, %s464_s1  ;;  %v587_v48 = vadd.f32 %v203_v43, %v65_v27  ;;  %v599_v57 = vadd.f32 %v227_v44, %v85_v53  ;;  %v327_v44 = vld [vmem:[%s771_s3 + $0x10] sm:$0xff] }
  0xf5   :  { %v244_v47 = vmax.f32 %v575_v42, 0.0  ;;  %v252_v62 = vmax.f32 %v596_v55, 0.0  ;;  %v336_v55 = vld [vmem:[%s771_s3 + $0x58] sm:$0xff] }
  0xf6   :  { %v207_v49 = vpop.f32.mrb[4].mxu0  ;;  %v231_v50 = vpop.f32.mrb[4].mxu1  ;;  %v245_v56 = vmax.f32 %v587_v48, 0.0  ;;  %v253_v0 = vmax.f32 %v599_v57, 0.0 }
  0xf7   :  { %v209_v51 = vpop.f32.mrb[5].mxu0  ;;  %v233_v52 = vpop.f32.mrb[5].mxu1  ;;  %266 = vrot.lane.b32.xlu0 %v250_v45, %s464_s1  ;;  %v604_v63 = vadd.f32 %v207_v49, %v70_v28  ;;  %v623_v7 = vadd.f32 %v231_v50, %v90_v6 }
  0xf8   :  { %260 = vrot.lane.b32.xlu1 %v244_v47, %s464_s1  ;;  %v607_v1 = vadd.f32 %v209_v51, %v70_v28  ;;  %v626_v9 = vadd.f32 %v233_v52, %v90_v6  ;;  %v330_v51 = vld [vmem:[%s771_s3 + $0x28] sm:$0xff] }
  0xf9   :  { %v246_v2 = vmax.f32 %v604_v63, 0.0  ;;  %v254_v12 = vmax.f32 %v623_v7, 0.0  ;;  %v340_v7 = vld [vmem:[%s771_s3 + $0x78] sm:$0xff] }
  0xfa   :  { %v213_v58 = vpop.f32.mrb[6].mxu0  ;;  %v237_v59 = vpop.f32.mrb[6].mxu1  ;;  %v247_v4 = vmax.f32 %v607_v1, 0.0  ;;  %v255_v14 = vmax.f32 %v626_v9, 0.0 }
  0xfb   :  { %v215_v60 = vpop.f32.mrb[7].mxu0  ;;  %v239_v61 = vpop.f32.mrb[7].mxu1  ;;  %274 = vrot.lane.b32.xlu0 %v243_v54, %s464_s1  ;;  %v616_v3 = vadd.f32 %v213_v58, %v75_v36  ;;  %v636_v13 = vadd.f32 %v237_v59, %v95_v11 }
  0xfc   :  { %276 = vrot.lane.b32.xlu1 %v245_v56, %s464_s1  ;;  %v619_v5 = vadd.f32 %v215_v60, %v75_v36  ;;  %v639_v15 = vadd.f32 %v239_v61, %v95_v11  ;;  %v325_v36 = vld [vmem:[%s771_s3] sm:$0xff] }
  0xfd   :  { %v248_v8 = vmax.f32 %v616_v3, 0.0  ;;  %v256_v16 = vmax.f32 %v636_v13, 0.0  ;;  %v335_v3 = vld [vmem:[%s771_s3 + $0x50] sm:$0xff] }
  0xfe   :  { %v249_v10 = vmax.f32 %v619_v5, 0.0  ;;  %v257_v17 = vmax.f32 %v639_v15, 0.0  ;;  %v390_v15 = vstv %s772_s4 }
  0xff   :  { %268 = vrot.lane.b32.xlu0 %v252_v62, %s464_s1 }
 0x100   :  { %284 = vrot.lane.b32.xlu1 %v253_v0, %s464_s1 }
 0x103   :  { %262 = vrot.lane.b32.xlu0 %v246_v2, %s464_s1 }
 0x104   :  { %278 = vrot.lane.b32.xlu1 %v247_v4, %s464_s1 }
 0x107   :  { %264 = vrot.lane.b32.xlu0 %v248_v8, %s464_s1 }
 0x108   :  { %280 = vrot.lane.b32.xlu1 %v249_v10, %s464_s1 }
 0x10b   :  { %270 = vrot.lane.b32.xlu0 %v254_v12, %s464_s1 }
 0x10c   :  { %286 = vrot.lane.b32.xlu1 %v255_v14, %s464_s1 }
 0x10f   :  { %272 = vrot.lane.b32.xlu0 %v256_v16, %s464_s1 }
 0x110   :  { %288 = vrot.lane.b32.xlu1 %v257_v17, %s464_s1 }
 0x165   :  { %v259_v18 = vpop.permute.xlu0 %258 }
 0x166   :  { %v283_v19 = vpop.permute.xlu1 %282 }
 0x169   :  { %v267_v21 = vpop.permute.xlu0 %266 }
 0x16a   :  { %v261_v22 = vpop.permute.xlu1 %260  ;;  %v297_v46 = vsel %vm292_vm2, %v267_v21, %v283_v19  ;;  %v305_v48 = vsel %vm292_vm2, %v283_v19, %v267_v21 }
 0x16b   :  { %v318_v19 = vmax.f32 %v251_v39, %v305_v48 }
 0x16d   :  { %v275_v24 = vpop.permute.xlu0 %274 }
 0x16e   :  { %v277_v25 = vpop.permute.xlu1 %276  ;;  %v293_v26 = vsel %vm292_vm2, %v259_v18, %v275_v24  ;;  %v301_v27 = vsel %vm292_vm2, %v275_v24, %v259_v18  ;;  %v317_v18 = vmax.f32 %v250_v45, %v297_v46 }
 0x16f   :  { %v294_v28 = vsel %vm292_vm2, %v261_v22, %v277_v25  ;;  %v302_v29 = vsel %vm292_vm2, %v277_v25, %v261_v22  ;;  %v309_v33 = vmax.f32 %v242_v37, %v293_v26  ;;  %v310_v34 = vmax.f32 %v243_v54, %v301_v27 }
 0x170   :  { %v311_v41 = vmax.f32 %v244_v47, %v294_v28  ;;  %v312_v43 = vmax.f32 %v245_v56, %v302_v29  ;;  %v329_v47 = vld [vmem:[%s771_s3 + $0x20] sm:$0xff] }
 0x171   :  { %v269_v30 = vpop.permute.xlu0 %268  ;;  %v341_v50 = vmul.f32 %v325_v36, %v309_v33  ;;  %v342_v42 = vmul.f32 %v326_v40, %v310_v34  ;;  %v349_v34 = vmul.f32 %v333_v38, %v317_v18  ;;  %v350_v36 = vmul.f32 %v334_v35, %v318_v19 }
 0x172   :  { %v285_v31 = vpop.permute.xlu1 %284  ;;  %v343_v54 = vmul.f32 %v327_v44, %v311_v41  ;;  %v344_v56 = vmul.f32 %v328_v32, %v312_v43 }
 0x173   :  { %v298_v61 = vsel %vm292_vm2, %v269_v30, %v285_v31  ;;  %v306_v63 = vsel %vm292_vm2, %v285_v31, %v269_v30 }
 0x174   :  { %v357_v39 = vadd.f32 %v343_v54, %v341_v50  ;;  %v370_v45 = vadd.f32 %v344_v56, %v342_v42  ;;  %v319_v25 = vmax.f32 %v252_v62, %v298_v61  ;;  %v320_v26 = vmax.f32 %v253_v0, %v306_v63  ;;  %v339_v42 = vld [vmem:[%s771_s3 + $0x70] sm:$0xff] }
 0x175   :  { %v263_v37 = vpop.permute.xlu0 %262 }
 0x176   :  { %v279_v49 = vpop.permute.xlu1 %278  ;;  %v351_v44 = vmul.f32 %v335_v3, %v319_v25  ;;  %v352_v32 = vmul.f32 %v336_v55, %v320_v26 }
 0x177   :  { %v295_v52 = vsel %vm292_vm2, %v263_v37, %v279_v49  ;;  %v303_v53 = vsel %vm292_vm2, %v279_v49, %v263_v37 }
 0x178   :  { %v313_v58 = vmax.f32 %v246_v2, %v295_v52  ;;  %v314_v59 = vmax.f32 %v247_v4, %v303_v53  ;;  %v331_v2 = vld [vmem:[%s771_s3 + $0x30] sm:$0xff]  ;;  %v332_v4 = vld [vmem:[%s771_s3 + $0x38] sm:$0xff] }
 0x179   :  { %v265_v60 = vpop.permute.xlu0 %264 }
 0x17a   :  { %v345_v1 = vmul.f32 %v329_v47, %v313_v58  ;;  %v346_v6 = vmul.f32 %v330_v51, %v314_v59  ;;  %v281_v11 = vpop.permute.xlu1 %280 }
 0x17b   :  { %v296_v20 = vsel %vm292_vm2, %v265_v60, %v281_v11  ;;  %v304_v21 = vsel %vm292_vm2, %v281_v11, %v265_v60 }
 0x17c   :  { %v315_v22 = vmax.f32 %v248_v8, %v296_v20  ;;  %v316_v24 = vmax.f32 %v249_v10, %v304_v21  ;;  %v358_v28 = vadd.f32 %v357_v39, %v345_v1  ;;  %v371_v29 = vadd.f32 %v370_v45, %v346_v6  ;;  %v337_v8 = vld [vmem:[%s771_s3 + $0x60] sm:$0xff]  ;;  %v338_v10 = vld [vmem:[%s771_s3 + $0x68] sm:$0xff] }
 0x17d   :  { %v271_v27 = vpop.permute.xlu0 %270 }
 0x17e   :  { %v347_v30 = vmul.f32 %v331_v2, %v315_v22  ;;  %v348_v31 = vmul.f32 %v332_v4, %v316_v24  ;;  %v287_v33 = vpop.permute.xlu1 %286 }
 0x17f   :  { %v299_v57 = vsel %vm292_vm2, %v271_v27, %v287_v33  ;;  %v307_v62 = vsel %vm292_vm2, %v287_v33, %v271_v27 }
 0x180   :  { %v359_v0 = vadd.f32 %v358_v28, %v347_v30  ;;  %v372_v5 = vadd.f32 %v371_v29, %v348_v31  ;;  %v321_v40 = vmax.f32 %v254_v12, %v299_v57  ;;  %v322_v41 = vmax.f32 %v255_v14, %v307_v62 }
 0x181   :  { %v273_v43 = vpop.permute.xlu0 %272 }
 0x182   :  { %v360_v37 = vadd.f32 %v359_v0, %v349_v34  ;;  %v373_v46 = vadd.f32 %v372_v5, %v350_v36  ;;  %v289_v48 = vpop.permute.xlu1 %288  ;;  %v353_v49 = vmul.f32 %v337_v8, %v321_v40  ;;  %v354_v50 = vmul.f32 %v338_v10, %v322_v41 }
 0x183   :  { %v300_v9 = vsel %vm292_vm2, %v273_v43, %v289_v48  ;;  %v308_v12 = vsel %vm292_vm2, %v289_v48, %v273_v43 }
 0x184   :  { %v361_v14 = vadd.f32 %v360_v37, %v351_v44  ;;  %v374_v47 = vadd.f32 %v373_v46, %v352_v32  ;;  %v323_v51 = vmax.f32 %v256_v16, %v300_v9  ;;  %v324_v52 = vmax.f32 %v257_v17, %v308_v12 }
 0x186   :  { %v362_v53 = vadd.f32 %v361_v14, %v353_v49  ;;  %v375_v54 = vadd.f32 %v374_v47, %v354_v50  ;;  %v355_v56 = vmul.f32 %v339_v42, %v323_v51  ;;  %v356_v58 = vmul.f32 %v340_v7, %v324_v52 }
 0x188   :  { %v363_v59 = vadd.f32 %v362_v53, %v355_v56  ;;  %v376_v60 = vadd.f32 %v375_v54, %v356_v58 }
 0x18a   :  { %v377_v61 = vrot.slane %v376_v60, 4  ;;  %v364_v63 = vrot.slane %v363_v59, 4 }
 0x18c   :  { %v378_v1 = vadd.f32 %v377_v61, %v376_v60  ;;  %v365_v6 = vadd.f32 %v364_v63, %v363_v59 }
 0x18e   :  { %v379_v23 = vrot.slane %v378_v1, 2  ;;  %v366_v11 = vrot.slane %v365_v6, 2 }
 0x190   :  { %v380_v18 = vadd.f32 %v379_v23, %v378_v1  ;;  %v367_v19 = vadd.f32 %v366_v11, %v365_v6 }
 0x192   :  { %v381_v2 = vrot.slane %v380_v18, 1  ;;  %v368_v13 = vrot.slane %v367_v19, 1 }
 0x194   :  { %v382_v16 = vadd.f32 %v381_v2, %v380_v18  ;;  %v369_v4 = vadd.f32 %v368_v13, %v367_v19 }
 0x196   :  { %385 = vadd.xlane.f32.xlu1 %v382_v16  ;;  %383 = vadd.xlane.f32.xlu0 %v369_v4 }
 0x223   :  { %v386_v17 = vpop.xlane.xlu1 %385  ;;  %v384_v20 = vpop.xlane.xlu0 %383 }
 0x224   :  { %v388_v21 = vsel %vm387_vm3, %v384_v20, %v386_v17 }
 0x225   :  { %v391_v38 = vadd.f32 %v390_v15, %v388_v21 }
 0x227   :  { %v392_v35 = vsub.f32 0.0, %v391_v38 }
 0x229   :  { %v393_v39 = vmul.f32 1.442695, %v392_v35 }
 0x22b   :  { %431 = vpow2.f32 %v393_v39 }
 0x235   :  { %v432_v45 = vpop.eup %431 }
 0x236   :  { %v395_v22 = vadd.f32 1.0, %v432_v45 }
 0x238   :  { %433 = vrcp.f32 %v395_v22 }
 0x242   :  { %v434_v24 = vpop.eup %433 }
 0x243   :  { %399 = vst.msk [vmem:[%s773_s5] sm:$0x3] %vm398_vm4, %v434_v24 }
 0x244   :  { %404 = vsyncpa [#allocation4], 1 }

</bundles_post_ra>
